<compile_context>
chip_gen: v7x
topology: tpu7x:2x2x1
jax: 0.10.0
libtpu: 0.0.40
codegen_flags: <defaults>
</compile_context>

<pallas_src>
import functools

import numpy as np
import jax
import jax.numpy as jnp
from jax import lax
from jax.experimental import pallas as pl
from jax.experimental.pallas import tpu as pltpu


def _round_up(x, m):
    return ((x + m - 1) // m) * m


def _warp_crop_kernel(hh, ww, c, theta_ref, coord_ref, mt_ref, out_ref):
    """F.affine_grid + F.grid_sample (bilinear, zeros padding, align_corners=False), restricted
    to the cropped output window, for one batch element, via a separable contraction.

    theta_ref : SMEM (B, 6)        flattened row-major 2x3 affine matrices
    coord_ref : VMEM (2, P)        normalized (xn, yn) coords of the cropped output pixels (static)
    mt_ref    : VMEM (1, C*W, H)   input map transposed so rows are (channel, column) and the
                                   contraction (lane) axis is the H source rows
    out_ref   : VMEM (1, C, P)     cropped + lane-padded output pixels (P = multiple of 128)
    """
    n = pl.program_id(0)

    t00 = theta_ref[n, 0]
    t01 = theta_ref[n, 1]
    t02 = theta_ref[n, 2]
    t10 = theta_ref[n, 3]
    t11 = theta_ref[n, 4]
    t12 = theta_ref[n, 5]

    xn = coord_ref[0:1, :]                       # (1, P)
    yn = coord_ref[1:2, :]                       # (1, P)

    # Affine transform (x is width, y is height, as in torch.nn.functional.affine_grid).
    xs = t00 * xn + t01 * yn + t02
    ys = t10 * xn + t11 * yn + t12

    # Normalized [-1, 1] -> source pixel coordinates (grid_sample, align_corners=False).
    ix = (xs + 1.0) * (0.5 * ww) - 0.5           # (1, P)
    iy = (ys + 1.0) * (0.5 * hh) - 0.5           # (1, P)

    # Factored bilinear hat weights (taps outside the image get zero weight => 'zeros' padding).
    u = lax.broadcasted_iota(jnp.int32, (hh, 1), 0).astype(jnp.float32)
    v = lax.broadcasted_iota(jnp.int32, (ww, 1), 0).astype(jnp.float32)
    wy = jnp.maximum(0.0, 1.0 - jnp.abs(iy - u))     # (H, P)
    wx = jnp.maximum(0.0, 1.0 - jnp.abs(ix - v))     # (W, P)

    # Separable sampling:
    #   out[ch, p] = sum_v wx[v, p] * sum_u M[ch, u, v] * wy[u, p]
    # One MXU matmul over the H axis, then a VPU multiply + sublane-group reduce over W.
    t = jnp.dot(mt_ref[0], wy, preferred_element_type=jnp.float32)      # (C*W, P)
    t = t.reshape(c, ww, t.shape[-1]) * wx[None, :, :]                   # (C, W, P)
    out_ref[0] = jnp.sum(t, axis=1).astype(out_ref.dtype)                # (C, P)


class TyCatcherPallas:
    """JAX/Pallas port of the PyTorch TyCatcher module."""

    def __init__(self, channel_input, channel_hidden, n_layers, x_iloc, y_iloc, key):
        if not isinstance(channel_hidden, (list, tuple)):
            channel_hidden = [channel_hidden] * n_layers
        assert len(channel_hidden) == n_layers, \
            'The length of "channel_hidden" should be same as n_layers'
        assert channel_hidden[-1] == 6, "last hidden dim must be 6 (view(-1, 2, 3))"
        self.n_layers = n_layers
        self.x_iloc = x_iloc
        self.y_iloc = y_iloc
        dims = [channel_input] + list(channel_hidden)
        self.params = []
        for i in range(n_layers):
            key, wk = jax.random.split(key)
            fan_in = dims[i]
            # kaiming_normal_ (fan_in, leaky_relu a=0): std = sqrt(2 / fan_in); bias = 0.
            w = jax.random.normal(wk, (dims[i + 1], dims[i]), jnp.float32) * jnp.sqrt(2.0 / fan_in)
            b = jnp.zeros((dims[i + 1],), jnp.float32)
            self.params.append((w, b))
        self._scale = jnp.array([0.1, 0.1, 1.0, 0.1, 0.1, 1.0], jnp.float32)
        self._offset = jnp.array([1.0, 0.0, 0.0, 0.0, 1.0, 0.0], jnp.float32)
        self._fwd_cache = {}   # (b, c, h, w) -> jitted forward

    # ----- forward builder: constants + pallas_call are constructed ONCE per input shape -----
    def _build_forward(self, b, c, hh, ww):
        y0, y1 = self.y_iloc
        x0, x1 = self.x_iloc
        crop_h, crop_w = y1 - y0, x1 - x0
        crop_hw = crop_h * crop_w
        p_pad = _round_up(crop_hw, 128)          # lane-dense output pixel axis
        cw = c * ww

        # Static per-output-pixel normalized coords (cropped window only, align_corners=False).
        p = np.arange(crop_hw)
        rows = y0 + p // crop_w
        cols = x0 + p % crop_w
        rows = np.pad(rows, (0, p_pad - crop_hw), mode="edge")
        cols = np.pad(cols, (0, p_pad - crop_hw), mode="edge")
        xn = (2.0 * cols + 1.0) / ww - 1.0
        yn = (2.0 * rows + 1.0) / hh - 1.0
        coord = jnp.asarray(np.stack([xn, yn]).astype(np.float32))          # (2, P)

        cost = pl.CostEstimate(
            flops=2 * b * cw * hh * p_pad + 3 * b * cw * p_pad,
            transcendentals=0,
            bytes_accessed=4 * (b * cw * hh + b * c * p_pad + b * 6 + 2 * p_pad),
        )

        warp = pl.pallas_call(
            functools.partial(_warp_crop_kernel, hh, ww, c),
            out_shape=jax.ShapeDtypeStruct((b, c, p_pad), jnp.float32),
            grid=(b,),
            in_specs=[
                pl.BlockSpec(memory_space=pltpu.MemorySpace.SMEM),        # theta_flat (B, 6)
                pl.BlockSpec((2, p_pad), lambda n: (0, 0)),               # coord (grid-invariant)
                pl.BlockSpec((1, cw, hh), lambda n: (n, 0, 0)),           # transposed map block
            ],
            out_specs=pl.BlockSpec((1, c, p_pad), lambda n: (n, 0, 0)),
            compiler_params=pltpu.CompilerParams(
                dimension_semantics=("parallel",),       # B=2 -> both v7x TensorCores
                vmem_limit_bytes=4 * 1024 * 1024,
            ),
            cost_estimate=cost,
        )

        params = self.params
        scale, offset = self._scale, self._offset

        def fwd(ty_info, rader_map):
            # Tiny MLP (no nonlinearity, matching the PyTorch module) + affine assembly:
            # theta_flat = mlp(x) * [0.1,0.1,1,0.1,0.1,1] + [1,0,0,0,1,0]
            h = ty_info.astype(jnp.float32)
            for w, bias in params:
                h = h @ w.T + bias
            theta_flat = h * scale + offset                               # (B, 6)
            theta = theta_flat.reshape(-1, 2, 3)

            # Layout plumbing for the separable contraction: (B,C,H,W) -> (B, C*W, H).
            mt = jnp.transpose(rader_map, (0, 1, 3, 2)).reshape(b, cw, hh).astype(jnp.float32)

            warped = warp(theta_flat, coord, mt)                          # (B, C, P) f32

            # Drop lane padding, restore (crop_h, crop_w); matches [:, :, y0:y1, x0:x1].
            sample = warped[:, :, :crop_hw].reshape(b, c, crop_h, crop_w)
            return sample.astype(rader_map.dtype), theta

        return jax.jit(fwd)

    def __call__(self, ty_info, rader_map):
        key = tuple(rader_map.shape)
        if key not in self._fwd_cache:
            self._fwd_cache[key] = self._build_forward(*key)
        return self._fwd_cache[key](ty_info, rader_map)


def _reference_forward(params, x_iloc, y_iloc, ty_info, rader_map):
    """Pure-jnp reference for affine_grid + grid_sample(bilinear, zeros, align_corners=False)."""
    b, c, hh, ww = rader_map.shape
    h = ty_info.astype(jnp.float32)
    for w, bias in params:
        h = h @ w.T + bias
    scale = jnp.array([0.1, 0.1, 1.0, 0.1, 0.1, 1.0], jnp.float32)
    offset = jnp.array([1.0, 0.0, 0.0, 0.0, 1.0, 0.0], jnp.float32)
    theta = (h * scale + offset).reshape(-1, 2, 3)

    xs_lin = (2.0 * jnp.arange(ww) + 1.0) / ww - 1.0
    ys_lin = (2.0 * jnp.arange(hh) + 1.0) / hh - 1.0
    gy, gx = jnp.meshgrid(ys_lin, xs_lin, indexing="ij")
    base = jnp.stack([gx, gy, jnp.ones_like(gx)], axis=-1).reshape(-1, 3)   # (hw, 3)
    src = jnp.einsum("bij,pj->bpi", theta, base)                            # (b, hw, 2)
    ix = (src[..., 0] + 1.0) * 0.5 * ww - 0.5
    iy = (src[..., 1] + 1.0) * 0.5 * hh - 0.5

    u = jnp.arange(hh, dtype=jnp.float32)
    v = jnp.arange(ww, dtype=jnp.float32)
    wy = jnp.maximum(0.0, 1.0 - jnp.abs(iy[..., None] - u))                 # (b, hw, hh)
    wx = jnp.maximum(0.0, 1.0 - jnp.abs(ix[..., None] - v))                 # (b, hw, ww)
    wfull = (wy[:, :, :, None] * wx[:, :, None, :]).reshape(b, hh * ww, hh * ww)
    m = rader_map.reshape(b, c, hh * ww).astype(jnp.float32)
    out = jnp.einsum("bcq,bpq->bcp", m, wfull).reshape(b, c, hh, ww)
    sample = out[:, :, y_iloc[0]:y_iloc[1], x_iloc[0]:x_iloc[1]]
    return sample.astype(rader_map.dtype), theta


if __name__ == "__main__":
    key = jax.random.PRNGKey(0)
    B, C, H, W = 2, 4, 16, 16
    C_IN = 8
    N_LAYERS = 2
    HIDDEN = [32, 6]
    X_ILOC = (2, 14)
    Y_ILOC = (3, 13)

    k_model, k_ty, k_map = jax.random.split(key, 3)
    model = TyCatcherPallas(C_IN, HIDDEN, N_LAYERS, X_ILOC, Y_ILOC, k_model)

    ty_info = jax.random.normal(k_ty, (B, C_IN), jnp.float32)
    rader_map = jax.random.normal(k_map, (B, C, H, W), jnp.float32)

    sample, theta = model(ty_info, rader_map)
    sample = jax.block_until_ready(sample)
    theta = jax.block_until_ready(theta)

    assert sample.shape == (B, C, Y_ILOC[1] - Y_ILOC[0], X_ILOC[1] - X_ILOC[0])
    assert theta.shape == (B, 2, 3)
    assert bool(jnp.all(jnp.isfinite(sample))) and bool(jnp.all(jnp.isfinite(theta)))

    ref_sample, ref_theta = _reference_forward(model.params, X_ILOC, Y_ILOC, ty_info, rader_map)
    assert bool(jnp.allclose(theta, ref_theta, atol=1e-5, rtol=1e-5)), "theta mismatch"
    assert bool(jnp.allclose(sample, ref_sample, atol=1e-4, rtol=1e-4)), (
        "sample mismatch, max abs err = "
        + str(float(jnp.max(jnp.abs(sample.astype(jnp.float32) - ref_sample.astype(jnp.float32))))))

    print("KERNEL_OK")
</pallas_src>

<mosaic_0001>
module attributes {stable_mosaic.version = 11 : i64} {
  func.func @_warp_crop_kernel(%arg0: i32, %arg1: memref<2x6xf32, #tpu.memory_space<smem>>, %arg2: memref<2x128xf32, #tpu.memory_space<vmem>>, %arg3: memref<1x64x16xf32, #tpu.memory_space<vmem>>, %arg4: memref<1x4x128xf32, #tpu.memory_space<vmem>>) attributes {dimension_semantics = [#tpu.dimension_semantics<parallel>], iteration_bounds = array<i64: 2>, scalar_prefetch = 0 : i64, scratch_operands = 0 : i64, tpu.core_type = #tpu.core_type<tc>, window_params = [{transform_indices = @transform_0, window_bounds = array<i64: 2, 6>}, {pipeline_mode = #tpu.pipeline_mode<synchronous>, transform_indices = @transform_1, window_bounds = array<i64: 2, 128>}, {transform_indices = @transform_2, window_bounds = array<i64: 1, 64, 16>}, {transform_indices = @transform_3, window_bounds = array<i64: 1, 4, 128>}]} {
    %0 = arith.index_cast %arg0 : i32 to index
    %c0 = arith.constant 0 : index
    %1 = memref.load %arg1[%0, %c0] : memref<2x6xf32, #tpu.memory_space<smem>>
    %2 = arith.index_cast %arg0 : i32 to index
    %c1 = arith.constant 1 : index
    %3 = memref.load %arg1[%2, %c1] : memref<2x6xf32, #tpu.memory_space<smem>>
    %4 = arith.index_cast %arg0 : i32 to index
    %c2 = arith.constant 2 : index
    %5 = memref.load %arg1[%4, %c2] : memref<2x6xf32, #tpu.memory_space<smem>>
    %6 = arith.index_cast %arg0 : i32 to index
    %c3 = arith.constant 3 : index
    %7 = memref.load %arg1[%6, %c3] : memref<2x6xf32, #tpu.memory_space<smem>>
    %8 = arith.index_cast %arg0 : i32 to index
    %c4 = arith.constant 4 : index
    %9 = memref.load %arg1[%8, %c4] : memref<2x6xf32, #tpu.memory_space<smem>>
    %10 = arith.index_cast %arg0 : i32 to index
    %c5 = arith.constant 5 : index
    %11 = memref.load %arg1[%10, %c5] : memref<2x6xf32, #tpu.memory_space<smem>>
    %c0_0 = arith.constant 0 : index
    %c0_1 = arith.constant 0 : index
    %12 = vector.load %arg2[%c0_0, %c0_1] : memref<2x128xf32, #tpu.memory_space<vmem>>, vector<1x128xf32>
    %c1_2 = arith.constant 1 : index
    %c0_3 = arith.constant 0 : index
    %13 = vector.load %arg2[%c1_2, %c0_3] : memref<2x128xf32, #tpu.memory_space<vmem>>, vector<1x128xf32>
    %14 = vector.broadcast %1 : f32 to vector<1x128xf32>
    %15 = arith.mulf %14, %12 : vector<1x128xf32>
    %16 = vector.broadcast %3 : f32 to vector<1x128xf32>
    %17 = arith.mulf %16, %13 : vector<1x128xf32>
    %18 = arith.addf %15, %17 : vector<1x128xf32>
    %19 = vector.broadcast %5 : f32 to vector<1x128xf32>
    %20 = arith.addf %18, %19 : vector<1x128xf32>
    %21 = vector.broadcast %7 : f32 to vector<1x128xf32>
    %22 = arith.mulf %21, %12 : vector<1x128xf32>
    %23 = vector.broadcast %9 : f32 to vector<1x128xf32>
    %24 = arith.mulf %23, %13 : vector<1x128xf32>
    %25 = arith.addf %22, %24 : vector<1x128xf32>
    %26 = vector.broadcast %11 : f32 to vector<1x128xf32>
    %27 = arith.addf %25, %26 : vector<1x128xf32>
    %cst = arith.constant 1.000000e+00 : f32
    %28 = vector.broadcast %cst : f32 to vector<1x128xf32>
    %29 = arith.addf %20, %28 : vector<1x128xf32>
    %cst_4 = arith.constant 8.000000e+00 : f32
    %30 = vector.broadcast %cst_4 : f32 to vector<1x128xf32>
    %31 = arith.mulf %29, %30 : vector<1x128xf32>
    %cst_5 = arith.constant 5.000000e-01 : f32
    %32 = vector.broadcast %cst_5 : f32 to vector<1x128xf32>
    %33 = arith.subf %31, %32 : vector<1x128xf32>
    %cst_6 = arith.constant 1.000000e+00 : f32
    %34 = vector.broadcast %cst_6 : f32 to vector<1x128xf32>
    %35 = arith.addf %27, %34 : vector<1x128xf32>
    %cst_7 = arith.constant 8.000000e+00 : f32
    %36 = vector.broadcast %cst_7 : f32 to vector<1x128xf32>
    %37 = arith.mulf %35, %36 : vector<1x128xf32>
    %cst_8 = arith.constant 5.000000e-01 : f32
    %38 = vector.broadcast %cst_8 : f32 to vector<1x128xf32>
    %39 = arith.subf %37, %38 : vector<1x128xf32>
    %40 = tpu.iota {dimensions = array<i32: 0>} : vector<16x1xi32>
    %41 = arith.sitofp %40 : vector<16x1xi32> to vector<16x1xf32>
    %42 = tpu.iota {dimensions = array<i32: 0>} : vector<16x1xi32>
    %43 = arith.sitofp %42 : vector<16x1xi32> to vector<16x1xf32>
    %44 = vector.broadcast %39 : vector<1x128xf32> to vector<16x128xf32>
    %45 = vector.broadcast %41 : vector<16x1xf32> to vector<16x128xf32>
    %46 = arith.subf %44, %45 : vector<16x128xf32>
    %47 = math.absf %46 : vector<16x128xf32>
    %cst_9 = arith.constant 1.000000e+00 : f32
    %48 = vector.broadcast %cst_9 : f32 to vector<16x128xf32>
    %49 = arith.subf %48, %47 : vector<16x128xf32>
    %cst_10 = arith.constant 0.000000e+00 : f32
    %50 = vector.broadcast %cst_10 : f32 to vector<16x128xf32>
    %51 = arith.maximumf %50, %49 : vector<16x128xf32>
    %52 = vector.broadcast %33 : vector<1x128xf32> to vector<16x128xf32>
    %53 = vector.broadcast %43 : vector<16x1xf32> to vector<16x128xf32>
    %54 = arith.subf %52, %53 : vector<16x128xf32>
    %55 = math.absf %54 : vector<16x128xf32>
    %cst_11 = arith.constant 1.000000e+00 : f32
    %56 = vector.broadcast %cst_11 : f32 to vector<16x128xf32>
    %57 = arith.subf %56, %55 : vector<16x128xf32>
    %cst_12 = arith.constant 0.000000e+00 : f32
    %58 = vector.broadcast %cst_12 : f32 to vector<16x128xf32>
    %59 = arith.maximumf %58, %57 : vector<16x128xf32>
    %c0_13 = arith.constant 0 : index
    %c0_14 = arith.constant 0 : index
    %c0_15 = arith.constant 0 : index
    %60 = vector.load %arg3[%c0_13, %c0_14, %c0_15] : memref<1x64x16xf32, #tpu.memory_space<vmem>>, vector<1x64x16xf32>
    %61 = vector.shape_cast %60 : vector<1x64x16xf32> to vector<64x16xf32>
    %cst_16 = arith.constant dense<0.000000e+00> : vector<64x128xf32>
    %62 = tpu.matmul %61, %51, %cst_16 {dimension_numbers = #tpu.dot_dimension_numbers<[1], [0], [0], [1], [0, 0, 1, 1], [], []>} : vector<64x16xf32>, vector<16x128xf32>, vector<64x128xf32> -> vector<64x128xf32>
    %63 = vector.shape_cast %62 : vector<64x128xf32> to vector<4x16x128xf32>
    %64 = vector.shape_cast %59 : vector<16x128xf32> to vector<1x16x128xf32>
    %65 = vector.broadcast %64 : vector<1x16x128xf32> to vector<4x16x128xf32>
    %66 = arith.mulf %63, %65 : vector<4x16x128xf32>
    %cst_17 = arith.constant dense<0.000000e+00> : vector<4x128xf32>
    %67 = vector.multi_reduction <add>, %66, %cst_17 [1] : vector<4x16x128xf32> to vector<4x128xf32>
    %c0_18 = arith.constant 0 : index
    %c0_19 = arith.constant 0 : index
    %c0_20 = arith.constant 0 : index
    %68 = vector.load %arg4[%c0_18, %c0_19, %c0_20] : memref<1x4x128xf32, #tpu.memory_space<vmem>>, vector<1x4x128xf32>
    %69 = vector.shape_cast %68 : vector<1x4x128xf32> to vector<4x128xf32>
    %70 = vector.shape_cast %67 : vector<4x128xf32> to vector<1x4x128xf32>
    tpu.vector_store %arg4[%c0_18, %c0_19, %c0_20], %70 {strides = array<i32>} : memref<1x4x128xf32, #tpu.memory_space<vmem>>, vector<1x4x128xf32>,
    return
  }
  func.func @transform_0(%arg0: i32) -> (i32, i32) {
    %c0_i32 = arith.constant 0 : i32
    %c0_i32_0 = arith.constant 0 : i32
    %c0_i32_1 = arith.constant 0 : i32
    return %c0_i32, %c0_i32_0 : i32, i32
  }
  func.func @transform_1(%arg0: i32) -> (i32, i32) {
    %c0_i32 = arith.constant 0 : i32
    %c0_i32_0 = arith.constant 0 : i32
    %c0_i32_1 = arith.constant 0 : i32
    return %c0_i32, %c0_i32_0 : i32, i32
  }
  func.func @transform_2(%arg0: i32) -> (i32, i32, i32) {
    %c0_i32 = arith.constant 0 : i32
    %c0_i32_0 = arith.constant 0 : i32
    %c0_i32_1 = arith.constant 0 : i32
    return %arg0, %c0_i32, %c0_i32_0 : i32, i32, i32
  }
  func.func @transform_3(%arg0: i32) -> (i32, i32, i32) {
    %c0_i32 = arith.constant 0 : i32
    %c0_i32_0 = arith.constant 0 : i32
    %c0_i32_1 = arith.constant 0 : i32
    return %arg0, %c0_i32, %c0_i32_0 : i32, i32, i32
  }
}

</mosaic_0001>

<bundles_post_ra>
// kernel: fwd.1
= control target key start
LH: loop header
LB: loop body
LE: loop exit
PB: predicated region body
PF: predicated region fallthrough
CT: control target
= control target key end

     0   :  { %8 = vsyncpa [#allocation3], 0  ;;  %s620_s12 = smov 0   ;;  %s688_s0 = inlined_call_operand.vmem [shape: f32[2,6], index: 0, kind: input, shape index: {}]   ;;  %s689_s1 = inlined_call_operand.vmem [shape: f32[2,128], index: 1, kind: input, shape index: {}]   ;;  %s690_s2 = inlined_call_operand.vmem [shape: f32[2,64,16], index: 2, kind: input, shape index: {}]   ;;  %s691_s3 = inlined_call_operand.vmem [shape: f32[2,4,128], index: 3, kind: output, shape index: {}]  }
   0x1 LB: > { %s626_s13 = sadd.s32 4294967295, %s597_s12   ;;  %p499_p0 = scmp.ge.s32.totalorder %s597_s12, 1  ;;  %s597_s12 = sphi %s620_s12, %s14_s12  }
   0x2   : > { %p113_p1 = scmp.lt.s32.totalorder %s597_s12, 3  ;;  %s126_s16 = sshll.u32 %s688_s0, 4  ;;  %s127_s16 = int_to_ptr.vmem [resolvable:$true] %s126_s16 }
   0x3   : > { %p561_p3 = scmp.eq.s32.totalorder %s626_s13, 0  ;;  %s572_s18 = scalar_lea.vmem %s127_s16, 32 }
   0x4   : > { %p633_p2 = pnand %p499_p0, %p113_p1  ;;  %p573_p6 = scmp.ne.s32.totalorder %s127_s16, %s572_s18 }
   0x5   : > { %p580_p10 = scmp.lt.s32.totalorder %s127_s16, %s127_s16  ;;  %p581_p11 = scmp.lt.s32.totalorder %s572_s18, %s572_s18 }
   0x6   : > { %p557_p4 = pneg %p633_p2 }
   0x7   : > { %p582_p12 = por %p581_p11, %p580_p10 }
   0x8   : > { %p558_p5 = pnand %p561_p3, %p557_p4 }
   0xa   : > { %p574_p7 = pneg %p558_p5 }
   0xc   : > { %p575_p8 = pnand %p574_p7, %p573_p6 }
   0xe   : > { %p576_p9 = pneg %p575_p8 }
  0x10   : > { %p583_p13 = pnand %p582_p12, %p576_p9 }
  0x12   : > { %586 = shalt.err (!%p583_p13)
}
  0x13   : > { %s599_s19 = smov [#allocation2]   ;;  %150 = sbr.rel (%p633_p2) target bundleno = 304 (0x130), region = 32 }
  0x14   : > { %560 = dma.vmem_to_smem (!%p558_p5), %s127_s16, 32, %s599_s19, [#allocation3]  }
  0x1a   : > { %592 = dma.done.wait (%p561_p3), [#allocation3], 32  }
  0x1b   : > { %594 = vsyncadd (%p561_p3), [#allocation3], 4294967264 }
  0x1c   : > { %156 = sfence }
  0x1d   : > { %s507_s20 = sshll.u32 %s626_s13, 7  ;;  %p174_p0 = scmp.lt.s32.totalorder %s626_s13, 1  ;;  %v195_v0 = vld [vmem:[%s689_s1] sm:$0x1]  ;;  %v196_v1 = vld [vmem:[%s689_s1 + $0x1] sm:$0x1]  ;;  %v217_v2 = vlaneseq }
  0x1e   : > { %s189_s21 = sadd.s32 3, %s507_s20  ;;  %s191_s22 = sadd.s32 4, %s507_s20  ;;  %vm254_vm0 = vcmask 130048   ;;  %vm424_vm1 = vcmask 1041409   ;;  %vm426_vm2 = vcmask 1042434   ;;  %vm428_vm3 = vcmask 1043459  }
  0x1f   : > { %s190_s23 = sld [smem:[#allocation2 + %s189_s21]]  ;;  %s193_s25 = sadd.s32 5, %s507_s20  ;;  %v218_v13 = vshrl.u32 %v217_v2, 7 }
  0x20   : > { %s192_s24 = sld [smem:[#allocation2 + %s191_s22]]  ;;  %s185_s28 = sadd.s32 1, %s507_s20 }
  0x21   : > { %s184_s26 = sld [smem:[#allocation2 + %s507_s20]]  ;;  %s694_s13 = smov (!%p174_p0, %s626_s13), 1  ;;  %v219_v19 = vadd.s32 8, %v218_v13  ;;  %v224_v22 = vsub.s32 0, %v218_v13  ;;  %v220_v25 = vcvt.s32.f32 %v218_v13 }
  0x22   : > { %s194_s27 = sld [smem:[#allocation2 + %s193_s25]]  ;;  %s187_s7 = sadd.s32 2, %s507_s20 }
  0x23   : > { %s186_s6 = sld [smem:[#allocation2 + %s185_s28]]  ;;  %s520_s8 = sshll.u32 %s694_s13, 6  ;;  %v221_v26 = vcvt.s32.f32 %v219_v19 }
  0x24   : > { %s188_s9 = sld [smem:[#allocation2 + %s187_s7]]  ;;  %s663_s14 = scalar_lea.vmem %s690_s2, %s520_s8 }
  0x25   : > { %v204_v3 = vstv %s190_s23  ;;  %v246_v7 = vld [vmem:[%s663_s14] sm:$0xff]  ;;  %v247_v42 = vld [vmem:[%s663_s14 + $0x8] sm:$0xff]  ;;  %v248_v44 = vld [vmem:[%s663_s14 + $0x10] sm:$0xff]  ;;  %s506_s15 = sshll.u32 %s694_s13, 2 }
  0x26   : > { %v206_v4 = vstv %s192_s24  ;;  %v205_v5 = vmul.f32 %v204_v3, %v195_v0  ;;  %v250_v8 = vld [vmem:[%s663_s14 + $0x20] sm:$0xff]  ;;  %535 = vmatprep.mubr.msk.f32.mxu0 %vm254_vm0, %v246_v7  ;;  %v251_v43 = vld [vmem:[%s663_s14 + $0x28] sm:$0xff]  ;;  %v252_v45 = vld [vmem:[%s663_s14 + $0x30] sm:$0xff]  ;;  %s182_s18 = scalar_lea.vmem %s691_s3, %s506_s15 }
  0x27   : > { %v207_v6 = vmul.f32 %v206_v4, %v196_v1  ;;  %v197_v9 = vstv %s184_s26  ;;  %541 = vmatprep.mubr.msk.f32.mxu1 %vm254_vm0, %v250_v8  ;;  %v249_v46 = vld [vmem:[%s663_s14 + $0x18] sm:$0xff] }
  0x28   : > { %v209_v10 = vstv %s194_s27  ;;  %v198_v11 = vmul.f32 %v197_v9, %v195_v0  ;;  %v253_v47 = vld [vmem:[%s663_s14 + $0x38] sm:$0xff] }
  0x29   : > { %v208_v12 = vadd.f32 %v207_v6, %v205_v5  ;;  %v199_v14 = vstv %s186_s6 }
  0x2a   : > { %v200_v16 = vmul.f32 %v199_v14, %v196_v1  ;;  %v202_v17 = vstv %s188_s9 }
  0x2b   : > { %v210_v15 = vadd.f32 %v209_v10, %v208_v12 }
  0x2c   : > { %v201_v20 = vadd.f32 %v200_v16, %v198_v11 }
  0x2d   : > { %v214_v18 = vadd.f32 1.0, %v210_v15 }
  0x2e   : > { %v203_v23 = vadd.f32 %v202_v17, %v201_v20 }
  0x2f   : > { %v215_v21 = vmul.f32 8.0, %v214_v18 }
  0x30   : > { %v211_v27 = vadd.f32 1.0, %v203_v23 }
  0x31   : > { %v509_v24 = vadd.f32 -0.5, %v215_v21 }
  0x32   : > { %v212_v29 = vmul.f32 8.0, %v211_v27 }
  0x33   : > { %v225_v28 = vrot.slane %v509_v24, %v224_v22 }
  0x34   : > { %v508_v32 = vadd.f32 -0.5, %v212_v29 }
  0x35   : > { %v226_v30 = vsub.f32 %v225_v28, %v220_v25  ;;  %v227_v31 = vsub.f32 %v225_v28, %v221_v26 }
  0x36   : > { %v237_v35 = vrot.slane %v508_v32, %v224_v22 }
  0x37   : > { %v228_v33 = vand.u32 2147483647, %v226_v30  ;;  %v229_v34 = vand.u32 2147483647, %v227_v31 }
  0x38   : > { %v239_v38 = vsub.f32 %v237_v35, %v221_v26  ;;  %v238_v48 = vsub.f32 %v237_v35, %v220_v25 }
  0x39   : > { %v230_v36 = vsub.f32 1.0, %v228_v33  ;;  %v231_v37 = vsub.f32 1.0, %v229_v34 }
  0x3a   : > { %v241_v49 = vand.u32 2147483647, %v239_v38  ;;  %v240_v50 = vand.u32 2147483647, %v238_v48 }
  0x3b   : > { %v232_v39 = vmax.f32 %v230_v36, 0.0  ;;  %v233_v40 = vmax.f32 %v231_v37, 0.0 }
  0x3c   : > { %v243_v51 = vsub.f32 1.0, %v241_v49  ;;  %v242_v52 = vsub.f32 1.0, %v240_v50 }
  0x3d   : > { %v547_v41 = vpack.c.bf16 %v233_v40, %v232_v39 }
  0x3e   : > { %v245_v53 = vmax.f32 %v243_v51, 0.0  ;;  %v244_v54 = vmax.f32 %v242_v52, 0.0 }
  0x3f   : > { %548 = vmatprep.subr.bf16.mxu0 %v547_v41  ;;  %551 = vmatprep.subr.bf16.mxu1 %v547_v41 }
  0x40   : > { %550 = vmatpush3.bf16.msra.mxu0 %v547_v41  ;;  %552 = vmatpush3.bf16.msra.mxu1 %v547_v41 }
  0x43   : > { %536 = vmatmul.mubr.msk.f32.vlgmr.msra.gmra.mrb[0].mxu0 %vm254_vm0, %v247_v42  ;;  %542 = vmatmul.mubr.msk.f32.vlgmr.msra.gmra.mrb[0].mxu1 %vm254_vm0, %v251_v43 }
  0x44   : > { %538 = vmatprep.mubr.msk.f32.mxu0 %vm254_vm0, %v248_v44  ;;  %544 = vmatprep.mubr.msk.f32.mxu1 %vm254_vm0, %v252_v45 }
  0x47   : > { %539 = vmatmul.mubr.msk.f32.gmra.mrb[2].mxu0 %vm254_vm0, %v249_v46  ;;  %545 = vmatmul.mubr.msk.f32.gmra.mrb[2].mxu1 %vm254_vm0, %v253_v47 }
 0x116   : > { %v537_v55 = vpop.f32.mrb[0].mxu0  ;;  %v543_v56 = vpop.f32.mrb[0].mxu1 }
 0x117   : > { %v385_v57 = vmul.f32 %v537_v55, %v245_v53  ;;  %v389_v58 = vmul.f32 %v543_v56, %v245_v53  ;;  %v345_v59 = vpop.f32.mrb[1].mxu0  ;;  %v365_v60 = vpop.f32.mrb[1].mxu1 }
 0x118   : > { %v384_v61 = vmul.f32 %v345_v59, %v244_v54  ;;  %v388_v62 = vmul.f32 %v365_v60, %v244_v54 }
 0x11a   : > { %v392_v63 = vadd.f32 %v385_v57, %v384_v61  ;;  %v406_v0 = vadd.f32 %v389_v58, %v388_v62  ;;  %v540_v1 = vpop.f32.mrb[2].mxu0  ;;  %v546_v2 = vpop.f32.mrb[2].mxu1 }
 0x11b   : > { %v387_v3 = vmul.f32 %v540_v1, %v245_v53  ;;  %v391_v4 = vmul.f32 %v546_v2, %v245_v53  ;;  %v355_v5 = vpop.f32.mrb[3].mxu0  ;;  %v375_v6 = vpop.f32.mrb[3].mxu1 }
 0x11c   : > { %v393_v7 = vrot.slane %v392_v63, 4  ;;  %v407_v8 = vrot.slane %v406_v0, 4  ;;  %v386_v9 = vmul.f32 %v355_v5, %v244_v54  ;;  %v390_v10 = vmul.f32 %v375_v6, %v244_v54 }
 0x11e   : > { %v394_v11 = vadd.f32 %v393_v7, %v392_v63  ;;  %v408_v12 = vadd.f32 %v407_v8, %v406_v0  ;;  %v399_v13 = vadd.f32 %v387_v3, %v386_v9  ;;  %v413_v14 = vadd.f32 %v391_v4, %v390_v10 }
 0x120   : > { %v395_v15 = vrot.slane %v394_v11, 2  ;;  %v409_v16 = vrot.slane %v408_v12, 2  ;;  %v400_v17 = vrot.slane %v399_v13, 4  ;;  %v414_v18 = vrot.slane %v413_v14, 4 }
 0x122   : > { %v396_v19 = vadd.f32 %v395_v15, %v394_v11  ;;  %v401_v20 = vadd.f32 %v400_v17, %v399_v13  ;;  %v415_v21 = vadd.f32 %v414_v18, %v413_v14  ;;  %v410_v22 = vadd.f32 %v409_v16, %v408_v12 }
 0x124   : > { %v402_v23 = vrot.slane %v401_v20, 2  ;;  %v416_v24 = vrot.slane %v415_v21, 2  ;;  %v397_v25 = vrot.slane %v396_v19, 1  ;;  %v411_v28 = vrot.slane %v410_v22, 1 }
 0x126   : > { %v403_v26 = vadd.f32 %v402_v23, %v401_v20  ;;  %v417_v27 = vadd.f32 %v416_v24, %v415_v21  ;;  %v398_v31 = vadd.f32 %v397_v25, %v396_v19  ;;  %v412_v33 = vadd.f32 %v411_v28, %v410_v22 }
 0x128   : > { %v404_v29 = vrot.slane %v403_v26, 1  ;;  %v418_v30 = vrot.slane %v417_v27, 1 }
 0x12a   : > { %v405_v32 = vadd.f32 %v404_v29, %v403_v26  ;;  %v419_v35 = vadd.f32 %v418_v30, %v417_v27 }
 0x12c   : > { %v425_v34 = vsel %vm424_vm1, %v405_v32, %v398_v31 }
 0x12d   : > { %v427_v36 = vsel %vm426_vm2, %v412_v33, %v425_v34 }
 0x12e   : > { %v429_v37 = vsel %vm428_vm3, %v419_v35, %v427_v36 }
 0x12f   : > { %431 = vst [vmem:[%s182_s18] sm:$0xf] %v429_v37 }
 0x130 PF: > { %s14_s12 = sadd.s32 1, %s597_s12  }
 0x131   : > { %p11_p1 = scmp.ge.s32.totalorder %s14_s12, 4  }
 0x133   :  { %13 = sbr.rel (!%p11_p1) target bundleno = 1 (0x1), region = 67 }
 0x13a   :  { %451 = vsyncpa [#allocation3], 1 }
 0x13b   :  { %453 = vsyncpa [#allocation3 + $0x1], 1 }

</bundles_post_ra>
